<compile_context>
chip_gen: v7x
topology: tpu7x:2x2x1
jax: 0.10.0
libtpu: 0.0.40
codegen_flags: <defaults>
</compile_context>

<pallas_src>
import functools
import math

import jax
import jax.numpy as jnp
from jax.experimental import pallas as pl
from jax.experimental.pallas import tpu as pltpu


def _round_up(x, m):
    return ((x + m - 1) // m) * m


def _generator_kernel(n_residual, *refs):
    """Fused Residual-stack + final Linear kernel.

    refs = (x_ref, w0, b0, w1, b1, ..., w_res..., w_final, b_final, out_ref)
    All weights are bf16 (BN already folded in), biases are f32 (1, N_p).
    """
    x_ref = refs[0]
    out_ref = refs[-1]
    p = refs[1:-1]

    h = x_ref[...]  # f32 (TILE_M, E_p)
    for li in range(n_residual):
        w = p[2 * li][...]        # bf16 (D_p, item_p), BN folded
        b = p[2 * li + 1][...]    # f32  (1, item_p)
        out = jnp.dot(h.astype(jnp.bfloat16), w,
                      preferred_element_type=jnp.float32) + b
        out = jnp.maximum(out, 0.0)                 # ReLU on the VPU (f32)
        h = jnp.concatenate([out, h], axis=-1)      # torch.cat([out, input_], 1)

    w_f = p[2 * n_residual][...]      # bf16 (D_total_p, data_p)
    b_f = p[2 * n_residual + 1][...]  # f32  (1, data_p)
    y = jnp.dot(h.astype(jnp.bfloat16), w_f,
                preferred_element_type=jnp.float32) + b_f
    out_ref[...] = y.astype(out_ref.dtype)


def init_generator_params(key, embedding_dim, generator_dim, data_dim):
    """Parameters mimicking torch defaults (Linear) plus non-trivial BN stats."""
    params = {"residual": [], "final": None}
    dim = embedding_dim
    for item in generator_dim:
        key, kw, kb, kg, kbe, km, kv = jax.random.split(key, 7)
        bound = 1.0 / math.sqrt(dim)
        layer = dict(
            W=jax.random.uniform(kw, (dim, item), jnp.float32, -bound, bound),
            b=jax.random.uniform(kb, (item,), jnp.float32, -bound, bound),
            gamma=jax.random.uniform(kg, (item,), jnp.float32, 0.5, 1.5),
            beta=0.1 * jax.random.normal(kbe, (item,), jnp.float32),
            running_mean=0.1 * jax.random.normal(km, (item,), jnp.float32),
            running_var=jax.random.uniform(kv, (item,), jnp.float32, 0.5, 1.5),
        )
        params["residual"].append(layer)
        dim += item
    key, kw, kb = jax.random.split(key, 3)
    bound = 1.0 / math.sqrt(dim)
    params["final"] = (
        jax.random.uniform(kw, (dim, data_dim), jnp.float32, -bound, bound),
        jax.random.uniform(kb, (data_dim,), jnp.float32, -bound, bound),
    )
    return params


def _place_padded(W, blocks, blocks_p, n_out, n_out_p):
    """Scatter W's row-blocks into a 128-aligned padded weight (zeros elsewhere)."""
    Wp = jnp.zeros((sum(blocks_p), n_out_p), W.dtype)
    r = rp = 0
    for bs, bsp in zip(blocks, blocks_p):
        Wp = Wp.at[rp:rp + bs, :n_out].set(W[r:r + bs, :])
        r += bs
        rp += bsp
    return Wp


def generator_forward(input_, params, *, bn_eps=1e-5, tile_m=256):
    """Apply the Generator to `input_` of shape (B, embedding_dim)."""
    B, E = input_.shape
    gen_items = [layer["W"].shape[1] for layer in params["residual"]]
    data_dim = params["final"][0].shape[1]

    # ---- lane-aligned (128) padded dims -------------------------------------
    E_p = _round_up(E, 128)
    items_p = [_round_up(it, 128) for it in gen_items]
    data_p = _round_up(data_dim, 128)

    # ---- batch tiling -------------------------------------------------------
    TILE_M = min(tile_m, _round_up(B, 8))
    B_p = _round_up(B, TILE_M)
    grid = (B_p // TILE_M,)

    x = jnp.zeros((B_p, E_p), jnp.float32).at[:B, :E].set(
        input_.astype(jnp.float32))

    # ---- fold BN (eval) into each Linear, pad, cast weights to bf16 ---------
    flat_params = []
    in_blocks = [E]        # unpadded block sizes of the current feature vector
    in_blocks_p = [E_p]    # padded counterparts (concat order: newest first)
    for layer, item, item_p in zip(params["residual"], gen_items, items_p):
        scale = layer["gamma"] / jnp.sqrt(layer["running_var"] + bn_eps)
        W_fold = layer["W"] * scale[None, :]
        b_fold = (layer["b"] - layer["running_mean"]) * scale + layer["beta"]
        Wp = _place_padded(W_fold, in_blocks, in_blocks_p, item, item_p)
        bp = jnp.zeros((1, item_p), jnp.float32).at[0, :item].set(b_fold)
        flat_params.append(Wp.astype(jnp.bfloat16))
        flat_params.append(bp)
        in_blocks = [item] + in_blocks
        in_blocks_p = [item_p] + in_blocks_p

    W_f, b_f = params["final"]
    Wfp = _place_padded(W_f, in_blocks, in_blocks_p, data_dim, data_p)
    bfp = jnp.zeros((1, data_p), jnp.float32).at[0, :data_dim].set(b_f)
    flat_params.append(Wfp.astype(jnp.bfloat16))
    flat_params.append(bfp)

    # ---- specs --------------------------------------------------------------
    in_specs = [pl.BlockSpec((TILE_M, E_p), lambda i: (i, 0))]
    for p_arr in flat_params:
        # constant index_map -> weights/biases stay VMEM-resident, DMA'd once
        in_specs.append(pl.BlockSpec(p_arr.shape, lambda i: (0, 0)))
    out_specs = pl.BlockSpec((TILE_M, data_p), lambda i: (i, 0))

    # ---- VMEM budget (sized against v7x's 64 MiB) ---------------------------
    param_bytes = sum(int(p.size) * p.dtype.itemsize for p in flat_params)
    d_total_p = E_p + sum(items_p)
    act_bytes = TILE_M * (d_total_p + max(items_p + [data_p])) * 4 * 2
    io_bytes = 2 * TILE_M * (E_p + data_p) * 4        # double-buffered x/out
    vmem_limit = int(min(max(io_bytes + 2 * param_bytes + act_bytes + (4 << 20),
                             32 << 20),
                         60 << 20))

    # ---- cost estimate ------------------------------------------------------
    flops = 0
    in_p = E_p
    for it_p in items_p:
        flops += 2 * B_p * in_p * it_p
        in_p += it_p
    flops += 2 * B_p * in_p * data_p
    cost = pl.CostEstimate(
        flops=flops,
        transcendentals=0,
        bytes_accessed=B_p * (E_p + data_p) * 4 + param_bytes,
    )

    kernel = functools.partial(_generator_kernel, len(params["residual"]))

    out = pl.pallas_call(
        kernel,
        out_shape=jax.ShapeDtypeStruct((B_p, data_p), jnp.float32),
        grid=grid,
        in_specs=in_specs,
        out_specs=out_specs,
        compiler_params=pltpu.CompilerParams(
            dimension_semantics=("parallel",),
            vmem_limit_bytes=vmem_limit,
        ),
        cost_estimate=cost,
    )(x, *flat_params)

    return out[:B, :data_dim]


def generator_forward_ref(input_, params, *, bn_eps=1e-5):
    """Pure-JAX reference (same bf16-matmul / f32-accumulate recipe)."""
    h = input_.astype(jnp.float32)
    for layer in params["residual"]:
        scale = layer["gamma"] / jnp.sqrt(layer["running_var"] + bn_eps)
        W = (layer["W"] * scale[None, :]).astype(jnp.bfloat16)
        b = (layer["b"] - layer["running_mean"]) * scale + layer["beta"]
        out = jnp.dot(h.astype(jnp.bfloat16), W,
                      preferred_element_type=jnp.float32) + b
        out = jnp.maximum(out, 0.0)
        h = jnp.concatenate([out, h], axis=1)
    W_f, b_f = params["final"]
    return jnp.dot(h.astype(jnp.bfloat16), W_f.astype(jnp.bfloat16),
                   preferred_element_type=jnp.float32) + b_f


if __name__ == "__main__":
    key = jax.random.PRNGKey(0)
    k_in, k_params = jax.random.split(key)

    # Small shapes consistent with the module.
    batch = 32
    embedding_dim = 32
    generator_dim = (32, 32)
    data_dim = 24

    x = jax.random.normal(k_in, (batch, embedding_dim), jnp.float32)
    params = init_generator_params(k_params, embedding_dim, generator_dim, data_dim)

    out = generator_forward(x, params)
    out = jax.block_until_ready(out)

    ref = generator_forward_ref(x, params)
    assert out.shape == (batch, data_dim), out.shape
    assert jnp.allclose(out, ref, atol=1e-3, rtol=1e-3), (out, ref)

    print("KERNEL_OK")
</pallas_src>

<mosaic_0001>
module attributes {stable_mosaic.version = 11 : i64} {
  func.func @_generator_kernel(%arg0: i32, %arg1: memref<32x128xf32, #tpu.memory_space<vmem>>, %arg2: memref<128x128xbf16, #tpu.memory_space<vmem>>, %arg3: memref<1x128xf32, #tpu.memory_space<vmem>>, %arg4: memref<256x128xbf16, #tpu.memory_space<vmem>>, %arg5: memref<1x128xf32, #tpu.memory_space<vmem>>, %arg6: memref<384x128xbf16, #tpu.memory_space<vmem>>, %arg7: memref<1x128xf32, #tpu.memory_space<vmem>>, %arg8: memref<32x128xf32, #tpu.memory_space<vmem>>) attributes {dimension_semantics = [#tpu.dimension_semantics<parallel>], iteration_bounds = array<i64: 1>, scalar_prefetch = 0 : i64, scratch_operands = 0 : i64, tpu.core_type = #tpu.core_type<tc>, window_params = [{transform_indices = @transform_0, window_bounds = array<i64: 32, 128>}, {pipeline_mode = #tpu.pipeline_mode<synchronous>, transform_indices = @transform_1, window_bounds = array<i64: 128, 128>}, {pipeline_mode = #tpu.pipeline_mode<synchronous>, transform_indices = @transform_2, window_bounds = array<i64: 1, 128>}, {pipeline_mode = #tpu.pipeline_mode<synchronous>, transform_indices = @transform_3, window_bounds = array<i64: 256, 128>}, {pipeline_mode = #tpu.pipeline_mode<synchronous>, transform_indices = @transform_4, window_bounds = array<i64: 1, 128>}, {pipeline_mode = #tpu.pipeline_mode<synchronous>, transform_indices = @transform_5, window_bounds = array<i64: 384, 128>}, {pipeline_mode = #tpu.pipeline_mode<synchronous>, transform_indices = @transform_6, window_bounds = array<i64: 1, 128>}, {transform_indices = @transform_7, window_bounds = array<i64: 32, 128>}]} {
    %c0 = arith.constant 0 : index
    %c0_0 = arith.constant 0 : index
    %0 = vector.load %arg1[%c0, %c0_0] : memref<32x128xf32, #tpu.memory_space<vmem>>, vector<32x128xf32>
    %c0_1 = arith.constant 0 : index
    %c0_2 = arith.constant 0 : index
    %1 = vector.load %arg2[%c0_1, %c0_2] : memref<128x128xbf16, #tpu.memory_space<vmem>>, vector<128x128xbf16>
    %c0_3 = arith.constant 0 : index
    %c0_4 = arith.constant 0 : index
    %2 = vector.load %arg3[%c0_3, %c0_4] : memref<1x128xf32, #tpu.memory_space<vmem>>, vector<1x128xf32>
    %3 = arith.truncf %0 : vector<32x128xf32> to vector<32x128xbf16>
    %cst = arith.constant dense<0.000000e+00> : vector<32x128xf32>
    %4 = tpu.matmul %3, %1, %cst {dimension_numbers = #tpu.dot_dimension_numbers<[1], [0], [0], [1], [0, 0, 1, 1], [], []>} : vector<32x128xbf16>, vector<128x128xbf16>, vector<32x128xf32> -> vector<32x128xf32>
    %5 = vector.broadcast %2 : vector<1x128xf32> to vector<32x128xf32>
    %6 = arith.addf %4, %5 : vector<32x128xf32>
    %cst_5 = arith.constant 0.000000e+00 : f32
    %7 = vector.broadcast %cst_5 : f32 to vector<32x128xf32>
    %8 = arith.maximumf %6, %7 : vector<32x128xf32>
    %9 = tpu.concatenate %8, %0 in 1 : vector<32x128xf32>, vector<32x128xf32> -> vector<32x256xf32>
    %c0_6 = arith.constant 0 : index
    %c0_7 = arith.constant 0 : index
    %10 = vector.load %arg4[%c0_6, %c0_7] : memref<256x128xbf16, #tpu.memory_space<vmem>>, vector<256x128xbf16>
    %c0_8 = arith.constant 0 : index
    %c0_9 = arith.constant 0 : index
    %11 = vector.load %arg5[%c0_8, %c0_9] : memref<1x128xf32, #tpu.memory_space<vmem>>, vector<1x128xf32>
    %12 = arith.truncf %9 : vector<32x256xf32> to vector<32x256xbf16>
    %cst_10 = arith.constant dense<0.000000e+00> : vector<32x128xf32>
    %13 = tpu.matmul %12, %10, %cst_10 {dimension_numbers = #tpu.dot_dimension_numbers<[1], [0], [0], [1], [0, 0, 1, 1], [], []>} : vector<32x256xbf16>, vector<256x128xbf16>, vector<32x128xf32> -> vector<32x128xf32>
    %14 = vector.broadcast %11 : vector<1x128xf32> to vector<32x128xf32>
    %15 = arith.addf %13, %14 : vector<32x128xf32>
    %cst_11 = arith.constant 0.000000e+00 : f32
    %16 = vector.broadcast %cst_11 : f32 to vector<32x128xf32>
    %17 = arith.maximumf %15, %16 : vector<32x128xf32>
    %18 = tpu.concatenate %17, %9 in 1 : vector<32x128xf32>, vector<32x256xf32> -> vector<32x384xf32>
    %c0_12 = arith.constant 0 : index
    %c0_13 = arith.constant 0 : index
    %19 = vector.load %arg6[%c0_12, %c0_13] : memref<384x128xbf16, #tpu.memory_space<vmem>>, vector<384x128xbf16>
    %c0_14 = arith.constant 0 : index
    %c0_15 = arith.constant 0 : index
    %20 = vector.load %arg7[%c0_14, %c0_15] : memref<1x128xf32, #tpu.memory_space<vmem>>, vector<1x128xf32>
    %21 = arith.truncf %18 : vector<32x384xf32> to vector<32x384xbf16>
    %cst_16 = arith.constant dense<0.000000e+00> : vector<32x128xf32>
    %22 = tpu.matmul %21, %19, %cst_16 {dimension_numbers = #tpu.dot_dimension_numbers<[1], [0], [0], [1], [0, 0, 1, 1], [], []>} : vector<32x384xbf16>, vector<384x128xbf16>, vector<32x128xf32> -> vector<32x128xf32>
    %23 = vector.broadcast %20 : vector<1x128xf32> to vector<32x128xf32>
    %24 = arith.addf %22, %23 : vector<32x128xf32>
    %c0_17 = arith.constant 0 : index
    %c0_18 = arith.constant 0 : index
    %25 = vector.load %arg8[%c0_17, %c0_18] : memref<32x128xf32, #tpu.memory_space<vmem>>, vector<32x128xf32>
    tpu.vector_store %arg8[%c0_17, %c0_18], %24 {strides = array<i32>} : memref<32x128xf32, #tpu.memory_space<vmem>>, vector<32x128xf32>,
    return
  }
  func.func @transform_0(%arg0: i32) -> (i32, i32) {
    %c0_i32 = arith.constant 0 : i32
    %c0_i32_0 = arith.constant 0 : i32
    return %arg0, %c0_i32 : i32, i32
  }
  func.func @transform_1(%arg0: i32) -> (i32, i32) {
    %c0_i32 = arith.constant 0 : i32
    %c0_i32_0 = arith.constant 0 : i32
    %c0_i32_1 = arith.constant 0 : i32
    return %c0_i32, %c0_i32_0 : i32, i32
  }
  func.func @transform_2(%arg0: i32) -> (i32, i32) {
    %c0_i32 = arith.constant 0 : i32
    %c0_i32_0 = arith.constant 0 : i32
    %c0_i32_1 = arith.constant 0 : i32
    return %c0_i32, %c0_i32_0 : i32, i32
  }
  func.func @transform_3(%arg0: i32) -> (i32, i32) {
    %c0_i32 = arith.constant 0 : i32
    %c0_i32_0 = arith.constant 0 : i32
    %c0_i32_1 = arith.constant 0 : i32
    return %c0_i32, %c0_i32_0 : i32, i32
  }
  func.func @transform_4(%arg0: i32) -> (i32, i32) {
    %c0_i32 = arith.constant 0 : i32
    %c0_i32_0 = arith.constant 0 : i32
    %c0_i32_1 = arith.constant 0 : i32
    return %c0_i32, %c0_i32_0 : i32, i32
  }
  func.func @transform_5(%arg0: i32) -> (i32, i32) {
    %c0_i32 = arith.constant 0 : i32
    %c0_i32_0 = arith.constant 0 : i32
    %c0_i32_1 = arith.constant 0 : i32
    return %c0_i32, %c0_i32_0 : i32, i32
  }
  func.func @transform_6(%arg0: i32) -> (i32, i32) {
    %c0_i32 = arith.constant 0 : i32
    %c0_i32_0 = arith.constant 0 : i32
    %c0_i32_1 = arith.constant 0 : i32
    return %c0_i32, %c0_i32_0 : i32, i32
  }
  func.func @transform_7(%arg0: i32) -> (i32, i32) {
    %c0_i32 = arith.constant 0 : i32
    %c0_i32_0 = arith.constant 0 : i32
    return %arg0, %c0_i32 : i32, i32
  }
}

</mosaic_0001>

<bundles_post_ra>
// kernel: tpu_custom_call.1
= control target key start
LH: loop header
LB: loop body
LE: loop exit
PB: predicated region body
PF: predicated region fallthrough
CT: control target
= control target key end

     0   :  { %12 = vsyncpa [#allocation3], 0  ;;  %s1217_s0 = inlined_call_operand.hbm [shape: f32[32,128], index: 0, kind: input, shape index: {}]   ;;  %s1218_s1 = inlined_call_operand.hbm [shape: bf16[128,128], index: 1, kind: input, shape index: {}]   ;;  %s1219_s2 = inlined_call_operand.vmem [shape: f32[1,128], index: 2, kind: input, shape index: {}]   ;;  %s1220_s3 = inlined_call_operand.hbm [shape: bf16[256,128], index: 3, kind: input, shape index: {}]   ;;  %s1221_s4 = inlined_call_operand.vmem [shape: f32[1,128], index: 4, kind: input, shape index: {}]   ;;  %s1222_s5 = inlined_call_operand.hbm [shape: bf16[384,128], index: 5, kind: input, shape index: {}]   ;;  %s1223_s6 = inlined_call_operand.vmem [shape: f32[1,128], index: 6, kind: input, shape index: {}]   ;;  %s1224_s7 = inlined_call_operand.hbm [shape: f32[32,128], index: 7, kind: output, shape index: {}]  }
   0x1   :  { %13 = vsyncpa [#allocation6], 0 }
   0x2   :  { %14 = vsyncpa [#allocation9], 0 }
   0x3   :  { %15 = vsyncpa [#allocation4], 0  ;;  %s1067_s24 = smov [#allocation5]   ;;  %s949_s28 = scalar_lea.hbm %s1218_s1, 1024 }
   0x4   :  { %s33_s25 = sshll.u32 %s1067_s24, 4  ;;  %p950_p0 = scmp.ne.s32.totalorder %s1218_s1, %s949_s28  ;;  %s34_s25 = int_to_ptr.vmem [resolvable:$true] %s33_s25 }
   0x5   :  { %p953_p1 = scmp.lt.u32.totalorder %s949_s28, %s1218_s1 }
   0x7   :  { %p955_p2 = pnand %p953_p1, %p950_p0 }
   0x9   :  { %958 = shalt.err (!%p955_p2)
}
   0xa   :  { %s959_s10 = scalar_lea.vmem %s34_s25, 1024  ;;  %p964_p4 = scmp.lt.s32.totalorder %s34_s25, %s34_s25 }
   0xb   :  { %p960_p3 = scmp.ne.s32.totalorder %s34_s25, %s959_s10  ;;  %p965_p5 = scmp.lt.s32.totalorder %s959_s10, %s959_s10 }
   0xd   :  { %p966_p6 = por %p965_p5, %p964_p4 }
   0xf   :  { %p967_p7 = pnand %p966_p6, %p960_p3 }
  0x11   :  { %970 = shalt.err (!%p967_p7)
}
  0x12   :  { %s1068_s11 = smov 64   ;;  %s1069_s12 = smov 4  }
  0x13   :  { %39 = dma.hbm_to_vmem [thread:$0]  %s1218_s1, 1024, %s34_s25, [#allocation6], %s1068_s11, %s1068_s11, %s1069_s12  }
  0x14   :  { %s1070_s15 = smov [#allocation2]   ;;  %s971_s19 = scalar_lea.hbm %s1217_s0, 512 }
  0x15   :  { %s21_s16 = sshll.u32 %s1070_s15, 4  ;;  %p972_p8 = scmp.ne.s32.totalorder %s1217_s0, %s971_s19  ;;  %s22_s16 = int_to_ptr.vmem [resolvable:$true] %s21_s16 }
  0x16   :  { %p975_p9 = scmp.lt.u32.totalorder %s971_s19, %s1217_s0 }
  0x18   :  { %p977_p10 = pnand %p975_p9, %p972_p8 }
  0x1a   :  { %980 = shalt.err (!%p977_p10)
}
  0x1b   :  { %s981_s24 = scalar_lea.vmem %s22_s16, 512  ;;  %p986_p12 = scmp.lt.s32.totalorder %s22_s16, %s22_s16 }
  0x1c   :  { %p982_p11 = scmp.ne.s32.totalorder %s22_s16, %s981_s24  ;;  %p987_p13 = scmp.lt.s32.totalorder %s981_s24, %s981_s24 }
  0x1e   :  { %p988_p0 = por %p987_p13, %p986_p12 }
  0x20   :  { %p989_p1 = pnand %p988_p0, %p982_p11 }
  0x22   :  { %992 = shalt.err (!%p989_p1)
}
  0x23   :  { %s1071_s1 = smov 128   ;;  %s1072_s25 = smov 8  }
  0x24   :  { %27 = dma.hbm_to_vmem [thread:$0]  %s1217_s0, 512, %s22_s16, [#allocation3], %s1071_s1, %s1071_s1, %s1072_s25  }
  0x25   :  { %s1073_s28 = smov [#allocation7]   ;;  %s1074_s30 = smov [#allocation8]  }
  0x26   :  { %s47_s29 = sshll.u32 %s1073_s28, 4  ;;  %s61_s8 = sshll.u32 %s1074_s30, 4  ;;  %s48_s29 = int_to_ptr.vmem [resolvable:$true] %s47_s29  ;;  %s1146_s8 = int_to_ptr.vmem [resolvable:$true] %s61_s8 }
  0x27   :  { %s993_s13 = scalar_lea.hbm %s1220_s3, 2048 }
  0x28   :  { %p994_p2 = scmp.ne.s32.totalorder %s1220_s3, %s993_s13  ;;  %p997_p3 = scmp.lt.u32.totalorder %s993_s13, %s1220_s3 }
  0x2a   :  { %p999_p4 = pnand %p997_p3, %p994_p2 }
  0x2c   :  { %1002 = shalt.err (!%p999_p4)
}
  0x2d   :  { %s1003_s0 = scalar_lea.vmem %s48_s29, 2048  ;;  %p1008_p6 = scmp.lt.s32.totalorder %s48_s29, %s48_s29 }
  0x2e   :  { %p1004_p5 = scmp.ne.s32.totalorder %s48_s29, %s1003_s0  ;;  %p1009_p7 = scmp.lt.s32.totalorder %s1003_s0, %s1003_s0 }
  0x30   :  { %p1010_p8 = por %p1009_p7, %p1008_p6 }
  0x32   :  { %p1011_p9 = pnand %p1010_p8, %p1004_p5 }
  0x34   :  { %1014 = shalt.err (!%p1011_p9)
}
  0x35   :  { %53 = dma.hbm_to_vmem [thread:$0]  %s1220_s3, 2048, %s48_s29, [#allocation6], %s1068_s11, %s1068_s11, %s1069_s12  }
  0x36   :  { %s1015_s22 = scalar_lea.hbm %s1222_s5, 3072 }
  0x37   :  { %p1016_p10 = scmp.ne.s32.totalorder %s1222_s5, %s1015_s22  ;;  %p1019_p11 = scmp.lt.u32.totalorder %s1015_s22, %s1222_s5 }
  0x39   :  { %p1021_p12 = pnand %p1019_p11, %p1016_p10 }
  0x3b   :  { %1024 = shalt.err (!%p1021_p12)
}
  0x3c   :  { %s1025_s28 = scalar_lea.vmem %s1146_s8, 3072  ;;  %p1030_p0 = scmp.lt.s32.totalorder %s1146_s8, %s1146_s8 }
  0x3d   :  { %p1026_p13 = scmp.ne.s32.totalorder %s1146_s8, %s1025_s28  ;;  %p1031_p1 = scmp.lt.s32.totalorder %s1025_s28, %s1025_s28 }
  0x3f   :  { %p1032_p2 = por %p1031_p1, %p1030_p0 }
  0x41   :  { %p1033_p3 = pnand %p1032_p2, %p1026_p13 }
  0x43   :  { %1036 = shalt.err (!%p1033_p3)
}
  0x44   :  { %67 = dma.hbm_to_vmem [thread:$0]  %s1222_s5, 3072, %s1146_s8, [#allocation9], %s1068_s11, %s1068_s11, %s1069_s12  }
  0x45   :  { %1059 = dma.done.wait [#allocation3], 512  }
  0x46   :  { %1060 = vsyncadd [#allocation3], 4294966784 }
  0x47   :  { %1061 = dma.done.wait [#allocation6], 3072  }
  0x48   :  { %1062 = vsyncadd [#allocation6], 4294964224 }
  0x49   :  { %1063 = dma.done.wait [#allocation9], 3072  }
  0x4a   :  { %1064 = vsyncadd [#allocation9], 4294964224  ;;  %v901_v0 = vld [vmem:[#allocation5] sm:$0xff]   ;;  %v902_v1 = vld [vmem:[#allocation5 + $0x8] sm:$0xff]   ;;  %s1075_s8 = smov [#allocation10]  }
  0x4b   :  { %852 = vmatprep.subr.bf16.mxu0 %v901_v0  ;;  %v903_v2 = vld [vmem:[#allocation5 + $0x10] sm:$0xff]   ;;  %v904_v3 = vld [vmem:[#allocation5 + $0x18] sm:$0xff]   ;;  %v83_v4 = vld [vmem:[#allocation2] sm:$0xff]  ;;  %s711_s9 = sshll.u32 %s1075_s8, 4  ;;  %s712_s9 = int_to_ptr.vmem [resolvable:$true] %s711_s9 }
  0x4c   :  { %853 = vmatpush3.bf16.msra.mxu0 %v901_v0  ;;  %v84_v5 = vld [vmem:[#allocation2 + $0x8] sm:$0xff]  ;;  %v905_v7 = vld [vmem:[#allocation5 + $0x20] sm:$0xff]   ;;  %v913_v12 = vld [vmem:[#allocation7 + $0x50] sm:$0xff]   ;;  %p1042_p5 = scmp.lt.s32.totalorder %s712_s9, %s712_s9 }
  0x4d   :  { %854 = vmatprep.subr.bf16.mxu0 %v902_v1  ;;  %v1183_v6 = vpack.c.bf16 %v84_v5, %v83_v4  ;;  %v909_v8 = vld [vmem:[#allocation7 + $0x40] sm:$0xff]   ;;  %v911_v10 = vld [vmem:[#allocation7 + $0x48] sm:$0xff]   ;;  %v914_v14 = vld [vmem:[#allocation7 + $0x10] sm:$0xff]  }
  0x4e   :  { %v910_v9 = vld [vmem:[#allocation7] sm:$0xff]   ;;  %786 = vmatprep.subr.bf16.mxu1 %v909_v8  ;;  %v912_v11 = vld [vmem:[#allocation7 + $0x8] sm:$0xff]   ;;  %v915_v15 = vld [vmem:[#allocation7 + $0x58] sm:$0xff]  }
  0x4f   :  { %868 = vmatprep.mubr.bf16.mxu0 %v1183_v6  ;;  %787 = vmatpush3.bf16.msra.mxu1 %v910_v9  ;;  %v906_v13 = vld [vmem:[#allocation5 + $0x28] sm:$0xff]   ;;  %v907_v16 = vld [vmem:[#allocation5 + $0x30] sm:$0xff]   ;;  %v916_v17 = vld [vmem:[#allocation7 + $0x18] sm:$0xff]  }
  0x50   :  { %855 = vmatpush3.bf16.msra.mxu0 %v902_v1  ;;  %382 = vmatprep.mubr.bf16.mxu1 %v1183_v6  ;;  %v917_v18 = vld [vmem:[#allocation7 + $0x60] sm:$0xff]   ;;  %v908_v19 = vld [vmem:[#allocation5 + $0x38] sm:$0xff]   ;;  %v919_v21 = vld [vmem:[#allocation7 + $0x68] sm:$0xff]  }
  0x51   :  { %856 = vmatprep.subr.bf16.mxu0 %v903_v2  ;;  %788 = vmatprep.subr.bf16.mxu1 %v911_v10  ;;  %v918_v20 = vld [vmem:[#allocation7 + $0x20] sm:$0xff]   ;;  %v85_v22 = vld [vmem:[#allocation2 + $0x10] sm:$0xff]  ;;  %v86_v23 = vld [vmem:[#allocation2 + $0x18] sm:$0xff] }
  0x52   :  { %v920_v24 = vld [vmem:[#allocation7 + $0x28] sm:$0xff]   ;;  %v1187_v25 = vpack.c.bf16 %v86_v23, %v85_v22  ;;  %v921_v26 = vld [vmem:[#allocation7 + $0x70] sm:$0xff]   ;;  %v923_v28 = vld [vmem:[#allocation7 + $0x78] sm:$0xff]  }
  0x53   :  { %789 = vmatpush3.bf16.msra.mxu1 %v912_v11  ;;  %v922_v27 = vld [vmem:[#allocation7 + $0x30] sm:$0xff]   ;;  %v924_v29 = vld [vmem:[#allocation7 + $0x38] sm:$0xff]   ;;  %v925_v30 = vld [vmem:[#allocation8 + $0x40] sm:$0xff]  }
  0x54   :  { %857 = vmatpush3.bf16.msra.mxu0 %v903_v2  ;;  %790 = vmatprep.subr.bf16.mxu1 %v913_v12  ;;  %v926_v31 = vld [vmem:[#allocation8] sm:$0xff]   ;;  %v927_v32 = vld [vmem:[#allocation8 + $0x48] sm:$0xff]   ;;  %v930_v35 = vld [vmem:[#allocation8 + $0x50] sm:$0xff]  }
  0x55   :  { %858 = vmatprep.subr.bf16.mxu0 %v904_v3  ;;  %v928_v33 = vld [vmem:[#allocation8 + $0x80] sm:$0xff]   ;;  %v929_v34 = vld [vmem:[#allocation8 + $0x8] sm:$0xff]   ;;  %v932_v36 = vld [vmem:[#allocation8 + $0x10] sm:$0xff]  }
  0x56   :  { %v933_v37 = vld [vmem:[#allocation8 + $0x58] sm:$0xff]   ;;  %v936_v39 = vld [vmem:[#allocation8 + $0x60] sm:$0xff]   ;;  %v931_v56 = vld [vmem:[#allocation8 + $0x88] sm:$0xff]  }
  0x57   :  { %791 = vmatpush3.bf16.msra.mxu1 %v914_v14  ;;  %v935_v38 = vld [vmem:[#allocation8 + $0x18] sm:$0xff]   ;;  %v938_v40 = vld [vmem:[#allocation8 + $0x20] sm:$0xff]   ;;  %v934_v57 = vld [vmem:[#allocation8 + $0x90] sm:$0xff]  }
  0x58   :  { %859 = vmatpush3.bf16.msra.mxu0 %v904_v3  ;;  %792 = vmatprep.subr.bf16.mxu1 %v915_v15  ;;  %v725_v41 = vld [vmem:[%s1219_s2] ss:$0 sm:$0xff]  ;;  %v937_v58 = vld [vmem:[#allocation8 + $0x98] sm:$0xff]   ;;  %v939_v59 = vld [vmem:[#allocation8 + $0x68] sm:$0xff]  }
  0x59   :  { %860 = vmatprep.subr.bf16.mxu0 %v905_v7  ;;  %v940_v60 = vld [vmem:[#allocation8 + $0xa0] sm:$0xff]   ;;  %v941_v61 = vld [vmem:[#allocation8 + $0x28] sm:$0xff]   ;;  %v942_v62 = vld [vmem:[#allocation8 + $0x70] sm:$0xff]  }
  0x5a   :  { %v943_v63 = vld [vmem:[#allocation8 + $0xa8] sm:$0xff]   ;;  %v944_v0 = vld [vmem:[#allocation8 + $0x30] sm:$0xff]   ;;  %v945_v1 = vld [vmem:[#allocation8 + $0x78] sm:$0xff]  }
  0x5b   :  { %793 = vmatpush3.bf16.msra.mxu1 %v916_v17  ;;  %v946_v2 = vld [vmem:[#allocation8 + $0xb0] sm:$0xff]   ;;  %v947_v3 = vld [vmem:[#allocation8 + $0x38] sm:$0xff]  }
  0x5c   :  { %861 = vmatpush3.bf16.msra.mxu0 %v905_v7  ;;  %794 = vmatprep.subr.bf16.mxu1 %v917_v18  ;;  %v948_v4 = vld [vmem:[#allocation8 + $0xb8] sm:$0xff]  }
  0x5d   :  { %862 = vmatprep.subr.bf16.mxu0 %v906_v13 }
  0x5f   :  { %795 = vmatpush3.bf16.msra.mxu1 %v918_v20 }
  0x60   :  { %863 = vmatpush3.bf16.msra.mxu0 %v906_v13  ;;  %796 = vmatprep.subr.bf16.mxu1 %v919_v21 }
  0x61   :  { %864 = vmatprep.subr.bf16.mxu0 %v907_v16 }
  0x63   :  { %797 = vmatpush3.bf16.msra.mxu1 %v920_v24 }
  0x64   :  { %865 = vmatpush3.bf16.msra.mxu0 %v907_v16  ;;  %798 = vmatprep.subr.bf16.mxu1 %v921_v26 }
  0x65   :  { %866 = vmatprep.subr.bf16.mxu0 %v908_v19 }
  0x67   :  { %799 = vmatpush3.bf16.msra.mxu1 %v922_v27 }
  0x68   :  { %867 = vmatpush3.bf16.msra.mxu0 %v908_v19  ;;  %800 = vmatprep.subr.bf16.mxu1 %v923_v28 }
  0x69   :  { %814 = vmatprep.subr.bf16.mxu0 %v925_v30 }
  0x6b   :  { %869 = vmatmul.mubr.bf16.vlgmr.msra.gmra.mrb[0].mxu0 %v1187_v25  ;;  %801 = vmatpush3.bf16.msra.mxu1 %v924_v29 }
  0x6c   :  { %815 = vmatpush3.bf16.msra.mxu0 %v926_v31  ;;  %872 = vmatprep.subr.bf16.mxu1 %v928_v33 }
  0x6d   :  { %816 = vmatprep.subr.bf16.mxu0 %v927_v32 }
  0x70   :  { %817 = vmatpush3.bf16.msra.mxu0 %v929_v34  ;;  %v751_v34 = vld [vmem:[%s1223_s6] ss:$0 sm:$0xff]  ;;  %s1037_s6 = scalar_lea.vmem %s712_s9, 512 }
  0x71   :  { %818 = vmatprep.subr.bf16.mxu0 %v930_v35  ;;  %p1038_p4 = scmp.ne.s32.totalorder %s712_s9, %s1037_s6  ;;  %p1043_p6 = scmp.lt.s32.totalorder %s1037_s6, %s1037_s6 }
  0x73   :  { %p1044_p7 = por %p1043_p6, %p1042_p5 }
  0x74   :  { %819 = vmatpush3.bf16.msra.mxu0 %v932_v36 }
  0x75   :  { %820 = vmatprep.subr.bf16.mxu0 %v933_v37  ;;  %p1045_p8 = pnand %p1044_p7, %p1038_p4 }
  0x78   :  { %821 = vmatpush3.bf16.msra.mxu0 %v935_v38 }
  0x79   :  { %822 = vmatprep.subr.bf16.mxu0 %v936_v39 }
  0x7c   :  { %823 = vmatpush3.bf16.msra.mxu0 %v938_v40 }
  0x7d   :  { %824 = vmatprep.subr.bf16.mxu0 %v939_v59 }
  0x80   :  { %825 = vmatpush3.bf16.msra.mxu0 %v941_v61 }
  0x81   :  { %826 = vmatprep.subr.bf16.mxu0 %v942_v62 }
  0x84   :  { %827 = vmatpush3.bf16.msra.mxu0 %v944_v0 }
  0x85   :  { %828 = vmatprep.subr.bf16.mxu0 %v945_v1 }
  0x88   :  { %829 = vmatpush3.bf16.msra.mxu0 %v947_v3 }
 0x13e   :  { %v870_v42 = vpop.f32.mrb[0].mxu0 }
 0x13f   :  { %v203_v43 = vadd.f32 %v870_v42, %v725_v41  ;;  %v194_v44 = vpop.f32.mrb[1].mxu0 }
 0x140   :  { %v195_v45 = vadd.f32 %v725_v41, %v194_v44  ;;  %v871_v46 = vpop.f32.mrb[2].mxu0 }
 0x141   :  { %v206_v47 = vadd.f32 %v871_v46, %v725_v41  ;;  %v197_v48 = vpop.f32.mrb[3].mxu0  ;;  %v211_v50 = vmax.f32 %v203_v43, 0.0 }
 0x142   :  { %v198_v49 = vadd.f32 %v725_v41, %v197_v48  ;;  %v209_v52 = vmax.f32 %v195_v45, 0.0 }
 0x143   :  { %v212_v51 = vmax.f32 %v206_v47, 0.0 }
 0x144   :  { %v210_v53 = vmax.f32 %v198_v49, 0.0 }
 0x145   :  { %v247_v54 = vpack.c.bf16 %v212_v51, %v211_v50 }
 0x146   :  { %v246_v55 = vpack.c.bf16 %v210_v53, %v209_v52 }
 0x148   :  { %383 = vmatmul.mubr.bf16.vlgmr.msra.gmra.mrb[0].mxu1 %v246_v55  ;;  %636 = vmatprep.mubr.bf16.mxu0 %v246_v55 }
 0x149   :  { %390 = vmatprep.mubr.bf16.mxu1 %v1187_v25  ;;  %873 = vmatpush3.bf16.msra.mxu1 %v928_v33 }
 0x14a   :  { %874 = vmatprep.subr.bf16.mxu1 %v931_v56 }
 0x14d   :  { %875 = vmatpush3.bf16.msra.mxu1 %v931_v56 }
 0x14e   :  { %876 = vmatprep.subr.bf16.mxu1 %v934_v57 }
 0x150   :  { %391 = vmatmul.mubr.bf16.gmra.mrb[4].mxu1 %v247_v54 }
 0x151   :  { %877 = vmatpush3.bf16.msra.mxu1 %v934_v57  ;;  %888 = vmatprep.mubr.bf16.mxu1 %v1183_v6  ;;  %v734_v6 = vld [vmem:[%s1221_s4] ss:$0 sm:$0xff] }
 0x152   :  { %878 = vmatprep.subr.bf16.mxu1 %v937_v58 }
 0x155   :  { %879 = vmatpush3.bf16.msra.mxu1 %v937_v58 }
 0x156   :  { %880 = vmatprep.subr.bf16.mxu1 %v940_v60 }
 0x159   :  { %881 = vmatpush3.bf16.msra.mxu1 %v940_v60 }
 0x15a   :  { %882 = vmatprep.subr.bf16.mxu1 %v943_v63 }
 0x15d   :  { %883 = vmatpush3.bf16.msra.mxu1 %v943_v63 }
 0x15e   :  { %884 = vmatprep.subr.bf16.mxu1 %v946_v2 }
 0x161   :  { %885 = vmatpush3.bf16.msra.mxu1 %v946_v2 }
 0x162   :  { %886 = vmatprep.subr.bf16.mxu1 %v948_v4 }
 0x165   :  { %887 = vmatpush3.bf16.msra.mxu1 %v948_v4 }
 0x168   :  { %889 = vmatmul.mubr.bf16.vlgmr.msra.gmra.mrb[8].mxu1 %v1187_v25 }
 0x21b   :  { %v802_v5 = vpop.f32.mrb[0].mxu1 }
 0x21c   :  { %v803_v7 = vpop.f32.mrb[1].mxu1 }
 0x21d   :  { %v804_v8 = vadd.f32 %v803_v7, %v802_v5  ;;  %v805_v9 = vpop.f32.mrb[2].mxu1 }
 0x21e   :  { %v806_v10 = vpop.f32.mrb[3].mxu1 }
 0x21f   :  { %v385_v11 = vadd.f32 %v804_v8, %v734_v6  ;;  %v807_v12 = vadd.f32 %v806_v10, %v805_v9 }
 0x221   :  { %v388_v13 = vadd.f32 %v807_v12, %v734_v6  ;;  %v399_v14 = vmax.f32 %v385_v11, 0.0 }
 0x223   :  { %v400_v15 = vmax.f32 %v388_v13, 0.0  ;;  %v808_v16 = vpop.f32.mrb[4].mxu1 }
 0x224   :  { %v809_v17 = vpop.f32.mrb[5].mxu1 }
 0x225   :  { %v452_v18 = vpack.c.bf16 %v400_v15, %v399_v14  ;;  %v810_v19 = vadd.f32 %v809_v17, %v808_v16  ;;  %v811_v20 = vpop.f32.mrb[6].mxu1 }
 0x226   :  { %v812_v21 = vpop.f32.mrb[7].mxu1 }
 0x227   :  { %v393_v22 = vadd.f32 %v810_v19, %v734_v6  ;;  %v813_v23 = vadd.f32 %v812_v21, %v811_v20  ;;  %637 = vmatmul.mubr.bf16.vlgmr.msra.gmra.mrb[4].mxu0 %v452_v18 }
 0x228   :  { %644 = vmatprep.mubr.bf16.mxu0 %v247_v54 }
 0x229   :  { %v396_v24 = vadd.f32 %v813_v23, %v734_v6  ;;  %v401_v25 = vmax.f32 %v393_v22, 0.0 }
 0x22b   :  { %v402_v26 = vmax.f32 %v396_v24, 0.0 }
 0x22d   :  { %v453_v27 = vpack.c.bf16 %v402_v26, %v401_v25 }
 0x22f   :  { %645 = vmatmul.mubr.bf16.gmra.mrb[8].mxu0 %v453_v27 }
 0x23b   :  { %v890_v28 = vpop.f32.mrb[8].mxu1 }
 0x23c   :  { %v687_v29 = vpop.f32.mrb[9].mxu1 }
 0x23d   :  { %v891_v30 = vpop.f32.mrb[10].mxu1 }
 0x23e   :  { %v690_v31 = vpop.f32.mrb[11].mxu1 }
 0x2fa   :  { %v830_v32 = vpop.f32.mrb[4].mxu0 }
 0x2fb   :  { %v831_v33 = vpop.f32.mrb[5].mxu0 }
 0x2fc   :  { %v832_v35 = vadd.f32 %v831_v33, %v830_v32  ;;  %v833_v36 = vpop.f32.mrb[6].mxu0 }
 0x2fd   :  { %v834_v37 = vpop.f32.mrb[7].mxu0 }
 0x2fe   :  { %v835_v38 = vadd.f32 %v834_v37, %v833_v36  ;;  %v639_v39 = vadd.f32 %v832_v35, %v751_v34 }
 0x300   :  { %v688_v40 = vadd.f32 %v687_v29, %v639_v39  ;;  %v642_v41 = vadd.f32 %v835_v38, %v751_v34 }
 0x302   :  { %702 = vst [vmem:[#allocation10] sm:$0xff] %v688_v40  ;;  %v691_v42 = vadd.f32 %v690_v31, %v642_v41  ;;  %v836_v43 = vpop.f32.mrb[8].mxu0 }
 0x303   :  { %v837_v44 = vpop.f32.mrb[9].mxu0 }
 0x304   :  { %703 = vst [vmem:[#allocation10 + $0x8] sm:$0xff] %v691_v42  ;;  %v838_v45 = vadd.f32 %v837_v44, %v836_v43  ;;  %v839_v46 = vpop.f32.mrb[10].mxu0 }
 0x305   :  { %v840_v47 = vpop.f32.mrb[11].mxu0 }
 0x306   :  { %v647_v48 = vadd.f32 %v838_v45, %v751_v34  ;;  %v841_v49 = vadd.f32 %v840_v47, %v839_v46 }
 0x308   :  { %v696_v50 = vadd.f32 %v890_v28, %v647_v48  ;;  %v650_v51 = vadd.f32 %v841_v49, %v751_v34 }
 0x30a   :  { %704 = vst [vmem:[#allocation10 + $0x10] sm:$0xff] %v696_v50  ;;  %v699_v52 = vadd.f32 %v891_v30, %v650_v51 }
 0x30c   :  { %705 = vst [vmem:[#allocation10 + $0x18] sm:$0xff] %v699_v52 }
 0x30d   :  { %1048 = shalt.err (!%p1045_p8)
}
 0x30e   :  { %s1049_s14 = scalar_lea.hbm %s1224_s7, 512 }
 0x30f   :  { %p1050_p9 = scmp.ne.s32.totalorder %s1224_s7, %s1049_s14  ;;  %p1053_p10 = scmp.lt.u32.totalorder %s1049_s14, %s1224_s7 }
 0x311   :  { %p1055_p11 = pnand %p1053_p10, %p1050_p9 }
 0x313   :  { %1058 = shalt.err (!%p1055_p11)
}
 0x314   :  { %717 = dma.vmem_to_hbm [thread:$0]  %s712_s9, 512, %s1224_s7, [#allocation4], %s1071_s1, %s1071_s1, %s1072_s25  }
 0x315   :  { %1065 = dma.done.wait [#allocation4], 512  }
 0x316   :  { %1066 = vsyncadd [#allocation4], 4294966784 }
 0x317   :  { %721 = vsyncpa [#allocation3], 1 }
 0x318   :  { %722 = vsyncpa [#allocation6], 1 }
 0x319   :  { %723 = vsyncpa [#allocation9], 1 }
 0x31a   :  { %724 = vsyncpa [#allocation4], 1 }

</bundles_post_ra>
